<compile_context>
chip_gen: v6e
topology: v6e:2x2x1
jax: 0.10.0
libtpu: 0.0.40
codegen_flags: <defaults>
</compile_context>

<pallas_src>
import jax
import jax.numpy as jnp
from jax.experimental import pallas as pl
from jax.experimental.pallas import tpu as pltpu

SUB, LANE = 8, 128  # one f32 vreg tile


def _model_kernel(x_ref, wp_ref, out_ref):
    """Single serial chain producing the module's return value.

    x_ref : SMEM (6,) f32   -- x0[0] (3,2) flattened row-major.
    wp_ref: VMEM (10,8,128) -- precomputed broadcast planes (see pack_params):
        [0..1] wt_rows : rows of linear.weight.T (sublane-replicated)
        [2..3] at_rows : rows 0..1 of rnn.weight_ih.T (sublane-replicated)
        [4..6] a_cols  : cols 0..2 of rnn.weight_ih (lane-replicated)
        [7]    brow3   : bias as a row, valid rows 0..2 / lanes 0..1
        [8]    brow2   : bias as a row, valid rows 0..1 / lanes 0..1
        [9]    bcol2   : bias as a col, valid rows 0..1 / lanes 0..1
    out_ref: VMEM (2,2) f32 -- v10 (== v11.transpose(0,1)).

    All weight/bias planes are exactly zero outside their logical corners and
    the x0 planes built below are too, so every carry equals the zero-padded
    logical tensor at every stage (no garbage leaks into the (2,2) corner).
    """
    wt_r0, wt_r1 = wp_ref[0], wp_ref[1]
    at_r0, at_r1 = wp_ref[2], wp_ref[3]
    a_c0, a_c1, a_c2 = wp_ref[4], wp_ref[5], wp_ref[6]
    brow3, brow2, bcol2 = wp_ref[7], wp_ref[8], wp_ref[9]

    ri = jax.lax.broadcasted_iota(jnp.int32, (SUB, LANE), 0)  # sublane index

    def xcol(j):
        # Column j of x0 (3 SMEM scalars) splatted across all lanes; rows 3..7
        # are zero.  Replaces the wrapper-side pad/transpose/stack + DMA.
        p = jnp.where(ri == 0, x_ref[j], 0.0)
        p = jnp.where(ri == 1, x_ref[2 + j], p)
        return jnp.where(ri == 2, x_ref[4 + j], p)

    def colb(z, j):  # column j of a carry, broadcast across lanes
        return jnp.broadcast_to(z[:, j:j + 1], (SUB, LANE))

    def rowb(z, j):  # row j of a carry, broadcast across sublanes
        return jnp.broadcast_to(z[j:j + 1, :], (SUB, LANE))

    # v0 = F.linear(x0, W) = x0 @ W.T                         logical (3,2)
    s = xcol(0) * wt_r0 + xcol(1) * wt_r1
    # (v1 = v0.permute(0,2,1) only feeds lstm1 -> dead/invalid; omitted.)

    # v2 = rnn(v0): tanh(v0 @ A[:, :2].T + b)                 logical (3,2)
    s = jnp.tanh(colb(s, 0) * at_r0 + colb(s, 1) * at_r1 + brow3)
    # v4 = rnn(v2.t()); carry its transpose: v4.T = tanh(A @ v2 + b_col) (2,2)
    r = jnp.tanh(a_c0 * rowb(s, 0) + a_c1 * rowb(s, 1) + a_c2 * rowb(s, 2)
                 + bcol2)
    # v6 = rnn(v4.t()) = tanh(v4 @ A[:, :2].T + b); v4 == r.T            (2,2)
    s = jnp.tanh(colb(r, 0) * at_r0 + colb(r, 1) * at_r1 + brow2)
    # v8 = rnn(v6.t()); carry v8.T = tanh(A[:, :2] @ v6 + b_col)         (2,2)
    r = jnp.tanh(a_c0 * rowb(s, 0) + a_c1 * rowb(s, 1) + bcol2)
    # v10 = rnn(v8.t()) = tanh(v8 @ A[:, :2].T + b)                      (2,2)
    s = jnp.tanh(colb(r, 0) * at_r0 + colb(r, 1) * at_r1 + brow2)

    # v11 = v10.t(); return v11.transpose(0,1) == v10
    out_ref[...] = s[0:2, 0:2]


def pack_params(params):
    """Pad/stack parameters into loop-invariant broadcast planes once
    (hoisted off the per-call path).  ~40 KiB total — trivial VMEM cost on
    v5e/v6e/v7x alike."""
    w = jnp.asarray(params["linear_w"], jnp.float32)      # (2,2) linear.weight
    a = jnp.asarray(params["rnn_w_ih"], jnp.float32)      # (2,3) rnn.weight_ih
    # hx=None => hidden contribution is zero, so rnn.weight_hh is unused.
    b = (jnp.asarray(params["rnn_b_ih"], jnp.float32)
         + jnp.asarray(params["rnn_b_hh"], jnp.float32))  # (2,)

    z = jnp.zeros((SUB, LANE), jnp.float32)

    def row_plane(vec):   # vec -> lanes [0,len), replicated down all sublanes
        n = vec.shape[0]
        return z.at[:, :n].set(jnp.broadcast_to(vec[None, :], (SUB, n)))

    def col_plane(vec):   # vec -> sublanes [0,len), replicated across lanes
        n = vec.shape[0]
        return z.at[:n, :].set(jnp.broadcast_to(vec[:, None], (n, LANE)))

    planes = [
        row_plane(w[:, 0]), row_plane(w[:, 1]),                        # wt rows
        row_plane(a[:, 0]), row_plane(a[:, 1]),                        # at rows
        col_plane(a[:, 0]), col_plane(a[:, 1]), col_plane(a[:, 2]),    # a cols
        z.at[:3, :2].set(jnp.broadcast_to(b[None, :], (3, 2))),        # brow3
        z.at[:2, :2].set(jnp.broadcast_to(b[None, :], (2, 2))),        # brow2
        z.at[:2, :2].set(jnp.broadcast_to(b[:, None], (2, 2))),        # bcol2
    ]
    return jnp.stack(planes)                                           # (10,8,128)


@jax.jit
def model_forward(x0, x1, packed_w):
    # x1 only feeds v12/v13/linear1/self.rnn(v12,...), all dead w.r.t. the
    # returned tensor (and partly invalid in torch); it is dropped.
    del x1
    x_flat = jnp.reshape(x0, (-1,)).astype(jnp.float32)   # (6,) = x0[0] row-major
    return pl.pallas_call(
        _model_kernel,
        out_shape=jax.ShapeDtypeStruct((2, 2), jnp.float32),
        in_specs=[pl.BlockSpec(memory_space=pltpu.MemorySpace.SMEM),
                  pl.BlockSpec(memory_space=pltpu.MemorySpace.VMEM)],
        out_specs=pl.BlockSpec(memory_space=pltpu.MemorySpace.VMEM),
    )(x_flat, packed_w)


def _reference(x0, params):
    """Pure-JAX reference of the same (reinterpreted) forward."""
    w = params["linear_w"]
    a = params["rnn_w_ih"]
    b = params["rnn_b_ih"] + params["rnn_b_hh"]

    def cell(z):  # RNNCell with hx=None, input zero-padded to width 3
        k = z.shape[-1]
        return jnp.tanh(z @ a[:, :k].T + b)

    v0 = x0[0] @ w.T                  # F.linear(x0, W)
    v = cell(v0)                      # v2
    for _ in range(4):                # v4, v6, v8, v10
        v = cell(v.T)
    return v                          # == v11.transpose(0, 1)


if __name__ == "__main__":
    key = jax.random.PRNGKey(0)
    kx0, kx1, kw, kwih, kwhh, kbi, kbh = jax.random.split(key, 7)
    x0 = jax.random.normal(kx0, (1, 3, 2), jnp.float32)
    x1 = jax.random.normal(kx1, (1, 3, 2), jnp.float32)
    params = {
        "linear_w": jax.random.normal(kw, (2, 2), jnp.float32),
        "rnn_w_ih": jax.random.normal(kwih, (2, 3), jnp.float32),
        "rnn_w_hh": jax.random.normal(kwhh, (2, 2), jnp.float32),  # unused: hx=None
        "rnn_b_ih": jax.random.normal(kbi, (2,), jnp.float32),
        "rnn_b_hh": jax.random.normal(kbh, (2,), jnp.float32),
    }

    packed_w = pack_params(params)             # parameter packing done once
    out = model_forward(x0, x1, packed_w)
    jax.block_until_ready(out)

    ref = _reference(x0, params)               # pins the stage-k schedule
    assert out.shape == (2, 2)
    assert jnp.allclose(out, ref, atol=1e-4, rtol=1e-4), (out, ref)
    print("KERNEL_OK")
</pallas_src>

<mosaic_0001>
module attributes {stable_mosaic.version = 11 : i64} {
  func.func @_model_kernel(%arg0: memref<6xf32, #tpu.memory_space<smem>>, %arg1: memref<10x8x128xf32, #tpu.memory_space<vmem>>, %arg2: memref<2x2xf32, #tpu.memory_space<vmem>>) attributes {dimension_semantics = [], scalar_prefetch = 0 : i64, scratch_operands = 0 : i64, tpu.core_type = #tpu.core_type<tc>} {
    %c0 = arith.constant 0 : index
    %c0_0 = arith.constant 0 : index
    %c0_1 = arith.constant 0 : index
    %0 = vector.load %arg1[%c0, %c0_0, %c0_1] : memref<10x8x128xf32, #tpu.memory_space<vmem>>, vector<1x8x128xf32>
    %1 = vector.shape_cast %0 : vector<1x8x128xf32> to vector<8x128xf32>
    %c1 = arith.constant 1 : index
    %c0_2 = arith.constant 0 : index
    %c0_3 = arith.constant 0 : index
    %2 = vector.load %arg1[%c1, %c0_2, %c0_3] : memref<10x8x128xf32, #tpu.memory_space<vmem>>, vector<1x8x128xf32>
    %3 = vector.shape_cast %2 : vector<1x8x128xf32> to vector<8x128xf32>
    %c2 = arith.constant 2 : index
    %c0_4 = arith.constant 0 : index
    %c0_5 = arith.constant 0 : index
    %4 = vector.load %arg1[%c2, %c0_4, %c0_5] : memref<10x8x128xf32, #tpu.memory_space<vmem>>, vector<1x8x128xf32>
    %5 = vector.shape_cast %4 : vector<1x8x128xf32> to vector<8x128xf32>
    %c3 = arith.constant 3 : index
    %c0_6 = arith.constant 0 : index
    %c0_7 = arith.constant 0 : index
    %6 = vector.load %arg1[%c3, %c0_6, %c0_7] : memref<10x8x128xf32, #tpu.memory_space<vmem>>, vector<1x8x128xf32>
    %7 = vector.shape_cast %6 : vector<1x8x128xf32> to vector<8x128xf32>
    %c4 = arith.constant 4 : index
    %c0_8 = arith.constant 0 : index
    %c0_9 = arith.constant 0 : index
    %8 = vector.load %arg1[%c4, %c0_8, %c0_9] : memref<10x8x128xf32, #tpu.memory_space<vmem>>, vector<1x8x128xf32>
    %9 = vector.shape_cast %8 : vector<1x8x128xf32> to vector<8x128xf32>
    %c5 = arith.constant 5 : index
    %c0_10 = arith.constant 0 : index
    %c0_11 = arith.constant 0 : index
    %10 = vector.load %arg1[%c5, %c0_10, %c0_11] : memref<10x8x128xf32, #tpu.memory_space<vmem>>, vector<1x8x128xf32>
    %11 = vector.shape_cast %10 : vector<1x8x128xf32> to vector<8x128xf32>
    %c6 = arith.constant 6 : index
    %c0_12 = arith.constant 0 : index
    %c0_13 = arith.constant 0 : index
    %12 = vector.load %arg1[%c6, %c0_12, %c0_13] : memref<10x8x128xf32, #tpu.memory_space<vmem>>, vector<1x8x128xf32>
    %13 = vector.shape_cast %12 : vector<1x8x128xf32> to vector<8x128xf32>
    %c7 = arith.constant 7 : index
    %c0_14 = arith.constant 0 : index
    %c0_15 = arith.constant 0 : index
    %14 = vector.load %arg1[%c7, %c0_14, %c0_15] : memref<10x8x128xf32, #tpu.memory_space<vmem>>, vector<1x8x128xf32>
    %15 = vector.shape_cast %14 : vector<1x8x128xf32> to vector<8x128xf32>
    %c8 = arith.constant 8 : index
    %c0_16 = arith.constant 0 : index
    %c0_17 = arith.constant 0 : index
    %16 = vector.load %arg1[%c8, %c0_16, %c0_17] : memref<10x8x128xf32, #tpu.memory_space<vmem>>, vector<1x8x128xf32>
    %17 = vector.shape_cast %16 : vector<1x8x128xf32> to vector<8x128xf32>
    %c9 = arith.constant 9 : index
    %c0_18 = arith.constant 0 : index
    %c0_19 = arith.constant 0 : index
    %18 = vector.load %arg1[%c9, %c0_18, %c0_19] : memref<10x8x128xf32, #tpu.memory_space<vmem>>, vector<1x8x128xf32>
    %19 = vector.shape_cast %18 : vector<1x8x128xf32> to vector<8x128xf32>
    %20 = tpu.iota {dimensions = array<i32: 0>} : vector<8x128xi32>
    %c0_i32 = arith.constant 0 : i32
    %21 = vector.broadcast %c0_i32 : i32 to vector<8x128xi32>
    %22 = arith.cmpi eq, %20, %21 : vector<8x128xi32>
    %c0_20 = arith.constant 0 : index
    %23 = memref.load %arg0[%c0_20] : memref<6xf32, #tpu.memory_space<smem>>
    %cst = arith.constant 0.000000e+00 : f32
    %24 = vector.broadcast %23 : f32 to vector<8x128xf32>
    %25 = vector.broadcast %cst : f32 to vector<8x128xf32>
    %26 = arith.select %22, %24, %25 : vector<8x128xi1>, vector<8x128xf32>
    %c1_i32 = arith.constant 1 : i32
    %27 = vector.broadcast %c1_i32 : i32 to vector<8x128xi32>
    %28 = arith.cmpi eq, %20, %27 : vector<8x128xi32>
    %c2_21 = arith.constant 2 : index
    %29 = memref.load %arg0[%c2_21] : memref<6xf32, #tpu.memory_space<smem>>
    %30 = vector.broadcast %29 : f32 to vector<8x128xf32>
    %31 = arith.select %28, %30, %26 : vector<8x128xi1>, vector<8x128xf32>
    %c2_i32 = arith.constant 2 : i32
    %32 = vector.broadcast %c2_i32 : i32 to vector<8x128xi32>
    %33 = arith.cmpi eq, %20, %32 : vector<8x128xi32>
    %c4_22 = arith.constant 4 : index
    %34 = memref.load %arg0[%c4_22] : memref<6xf32, #tpu.memory_space<smem>>
    %35 = vector.broadcast %34 : f32 to vector<8x128xf32>
    %36 = arith.select %33, %35, %31 : vector<8x128xi1>, vector<8x128xf32>
    %37 = arith.mulf %36, %1 : vector<8x128xf32>
    %c0_i32_23 = arith.constant 0 : i32
    %38 = vector.broadcast %c0_i32_23 : i32 to vector<8x128xi32>
    %39 = arith.cmpi eq, %20, %38 : vector<8x128xi32>
    %c1_24 = arith.constant 1 : index
    %40 = memref.load %arg0[%c1_24] : memref<6xf32, #tpu.memory_space<smem>>
    %cst_25 = arith.constant 0.000000e+00 : f32
    %41 = vector.broadcast %40 : f32 to vector<8x128xf32>
    %42 = vector.broadcast %cst_25 : f32 to vector<8x128xf32>
    %43 = arith.select %39, %41, %42 : vector<8x128xi1>, vector<8x128xf32>
    %c1_i32_26 = arith.constant 1 : i32
    %44 = vector.broadcast %c1_i32_26 : i32 to vector<8x128xi32>
    %45 = arith.cmpi eq, %20, %44 : vector<8x128xi32>
    %c3_27 = arith.constant 3 : index
    %46 = memref.load %arg0[%c3_27] : memref<6xf32, #tpu.memory_space<smem>>
    %47 = vector.broadcast %46 : f32 to vector<8x128xf32>
    %48 = arith.select %45, %47, %43 : vector<8x128xi1>, vector<8x128xf32>
    %c2_i32_28 = arith.constant 2 : i32
    %49 = vector.broadcast %c2_i32_28 : i32 to vector<8x128xi32>
    %50 = arith.cmpi eq, %20, %49 : vector<8x128xi32>
    %c5_29 = arith.constant 5 : index
    %51 = memref.load %arg0[%c5_29] : memref<6xf32, #tpu.memory_space<smem>>
    %52 = vector.broadcast %51 : f32 to vector<8x128xf32>
    %53 = arith.select %50, %52, %48 : vector<8x128xi1>, vector<8x128xf32>
    %54 = arith.mulf %53, %3 : vector<8x128xf32>
    %55 = arith.addf %37, %54 : vector<8x128xf32>
    %56 = vector.extract_strided_slice %55 {offsets = [0, 0], sizes = [8, 1], strides = [1, 1]} : vector<8x128xf32> to vector<8x1xf32>
    %57 = vector.shape_cast %56 : vector<8x1xf32> to vector<8x1xf32>
    %58 = vector.broadcast %57 : vector<8x1xf32> to vector<8x128xf32>
    %59 = arith.mulf %58, %5 : vector<8x128xf32>
    %60 = vector.extract_strided_slice %55 {offsets = [0, 1], sizes = [8, 1], strides = [1, 1]} : vector<8x128xf32> to vector<8x1xf32>
    %61 = vector.shape_cast %60 : vector<8x1xf32> to vector<8x1xf32>
    %62 = vector.broadcast %61 : vector<8x1xf32> to vector<8x128xf32>
    %63 = arith.mulf %62, %7 : vector<8x128xf32>
    %64 = arith.addf %59, %63 : vector<8x128xf32>
    %65 = arith.addf %64, %15 : vector<8x128xf32>
    %66 = math.tanh %65 : vector<8x128xf32>
    %67 = vector.extract_strided_slice %66 {offsets = [0, 0], sizes = [1, 128], strides = [1, 1]} : vector<8x128xf32> to vector<1x128xf32>
    %68 = vector.shape_cast %67 : vector<1x128xf32> to vector<1x128xf32>
    %69 = vector.broadcast %68 : vector<1x128xf32> to vector<8x128xf32>
    %70 = arith.mulf %9, %69 : vector<8x128xf32>
    %71 = vector.extract_strided_slice %66 {offsets = [1, 0], sizes = [1, 128], strides = [1, 1]} : vector<8x128xf32> to vector<1x128xf32>
    %72 = vector.shape_cast %71 : vector<1x128xf32> to vector<1x128xf32>
    %73 = vector.broadcast %72 : vector<1x128xf32> to vector<8x128xf32>
    %74 = arith.mulf %11, %73 : vector<8x128xf32>
    %75 = arith.addf %70, %74 : vector<8x128xf32>
    %76 = vector.extract_strided_slice %66 {offsets = [2, 0], sizes = [1, 128], strides = [1, 1]} : vector<8x128xf32> to vector<1x128xf32>
    %77 = vector.shape_cast %76 : vector<1x128xf32> to vector<1x128xf32>
    %78 = vector.broadcast %77 : vector<1x128xf32> to vector<8x128xf32>
    %79 = arith.mulf %13, %78 : vector<8x128xf32>
    %80 = arith.addf %75, %79 : vector<8x128xf32>
    %81 = arith.addf %80, %19 : vector<8x128xf32>
    %82 = math.tanh %81 : vector<8x128xf32>
    %83 = vector.extract_strided_slice %82 {offsets = [0, 0], sizes = [8, 1], strides = [1, 1]} : vector<8x128xf32> to vector<8x1xf32>
    %84 = vector.shape_cast %83 : vector<8x1xf32> to vector<8x1xf32>
    %85 = vector.broadcast %84 : vector<8x1xf32> to vector<8x128xf32>
    %86 = arith.mulf %85, %5 : vector<8x128xf32>
    %87 = vector.extract_strided_slice %82 {offsets = [0, 1], sizes = [8, 1], strides = [1, 1]} : vector<8x128xf32> to vector<8x1xf32>
    %88 = vector.shape_cast %87 : vector<8x1xf32> to vector<8x1xf32>
    %89 = vector.broadcast %88 : vector<8x1xf32> to vector<8x128xf32>
    %90 = arith.mulf %89, %7 : vector<8x128xf32>
    %91 = arith.addf %86, %90 : vector<8x128xf32>
    %92 = arith.addf %91, %17 : vector<8x128xf32>
    %93 = math.tanh %92 : vector<8x128xf32>
    %94 = vector.extract_strided_slice %93 {offsets = [0, 0], sizes = [1, 128], strides = [1, 1]} : vector<8x128xf32> to vector<1x128xf32>
    %95 = vector.shape_cast %94 : vector<1x128xf32> to vector<1x128xf32>
    %96 = vector.broadcast %95 : vector<1x128xf32> to vector<8x128xf32>
    %97 = arith.mulf %9, %96 : vector<8x128xf32>
    %98 = vector.extract_strided_slice %93 {offsets = [1, 0], sizes = [1, 128], strides = [1, 1]} : vector<8x128xf32> to vector<1x128xf32>
    %99 = vector.shape_cast %98 : vector<1x128xf32> to vector<1x128xf32>
    %100 = vector.broadcast %99 : vector<1x128xf32> to vector<8x128xf32>
    %101 = arith.mulf %11, %100 : vector<8x128xf32>
    %102 = arith.addf %97, %101 : vector<8x128xf32>
    %103 = arith.addf %102, %19 : vector<8x128xf32>
    %104 = math.tanh %103 : vector<8x128xf32>
    %105 = vector.extract_strided_slice %104 {offsets = [0, 0], sizes = [8, 1], strides = [1, 1]} : vector<8x128xf32> to vector<8x1xf32>
    %106 = vector.shape_cast %105 : vector<8x1xf32> to vector<8x1xf32>
    %107 = vector.broadcast %106 : vector<8x1xf32> to vector<8x128xf32>
    %108 = arith.mulf %107, %5 : vector<8x128xf32>
    %109 = vector.extract_strided_slice %104 {offsets = [0, 1], sizes = [8, 1], strides = [1, 1]} : vector<8x128xf32> to vector<8x1xf32>
    %110 = vector.shape_cast %109 : vector<8x1xf32> to vector<8x1xf32>
    %111 = vector.broadcast %110 : vector<8x1xf32> to vector<8x128xf32>
    %112 = arith.mulf %111, %7 : vector<8x128xf32>
    %113 = arith.addf %108, %112 : vector<8x128xf32>
    %114 = arith.addf %113, %17 : vector<8x128xf32>
    %115 = math.tanh %114 : vector<8x128xf32>
    %116 = vector.extract_strided_slice %115 {offsets = [0, 0], sizes = [2, 2], strides = [1, 1]} : vector<8x128xf32> to vector<2x2xf32>
    %c0_30 = arith.constant 0 : index
    %c0_31 = arith.constant 0 : index
    %117 = vector.load %arg2[%c0_30, %c0_31] : memref<2x2xf32, #tpu.memory_space<vmem>>, vector<2x2xf32>
    tpu.vector_store %arg2[%c0_30, %c0_31], %116 {strides = array<i32>} : memref<2x2xf32, #tpu.memory_space<vmem>>, vector<2x2xf32>,
    return
  }
}

</mosaic_0001>

<bundles_post_ra>
// kernel: model_forward.1
= control target key start
LH: loop header
LB: loop body
LE: loop exit
PB: predicated region body
PF: predicated region fallthrough
CT: control target
= control target key end

     0   :  { %7 = vsyncpa [#allocation5], 0  ;;  %s303_s0 = inlined_call_operand.vmem [shape: f32[6], index: 0, kind: input, shape index: {}]   ;;  %s304_s1 = inlined_call_operand.hbm [shape: f32[10,8,128], index: 1, kind: input, shape index: {}]   ;;  %s305_s2 = inlined_call_operand.hbm [shape: f32[2,2], index: 2, kind: output, shape index: {}]  }
   0x1   :  { %8 = vsyncpa [#allocation3], 0 }
   0x2   :  { %9 = vsyncpa [#allocation4], 0  ;;  %s16_s11 = sshll.u32 %s303_s0, 4  ;;  %s17_s11 = int_to_ptr.vmem [resolvable:$true] %s16_s11 }
   0x3   :  { %s203_s12 = scalar_lea.vmem %s17_s11, 16  ;;  %p208_p1 = scmp.lt.s32.totalorder %s17_s11, %s17_s11 }
   0x4   :  { %p204_p0 = scmp.ne.s32.totalorder %s17_s11, %s203_s12  ;;  %p209_p2 = scmp.lt.s32.totalorder %s203_s12, %s203_s12 }
   0x6   :  { %p210_p3 = por %p209_p2, %p208_p1 }
   0x8   :  { %p211_p4 = pnand %p210_p3, %p204_p0 }
   0xa   :  { %214 = shalt.err (!%p211_p4)
}
   0xb   :  { %s261_s13 = smov [#allocation2]   ;;  %s262_s14 = smov [#allocation6]  }
   0xc   :  { %19 = dma.vmem_to_smem %s17_s11, 16, %s261_s13, [#allocation5]  }
   0xd   :  { %s25_s15 = sshll.u32 %s262_s14, 4  ;;  %s26_s15 = int_to_ptr.vmem [resolvable:$true] %s25_s15 }
   0xe   :  { %s223_s16 = scalar_lea.vmem %s26_s15, 1280  ;;  %p228_p6 = scmp.lt.s32.totalorder %s26_s15, %s26_s15 }
   0xf   :  { %p224_p5 = scmp.ne.s32.totalorder %s26_s15, %s223_s16  ;;  %p229_p7 = scmp.lt.s32.totalorder %s223_s16, %s223_s16 }
  0x11   :  { %p230_p8 = por %p229_p7, %p228_p6 }
  0x13   :  { %p231_p9 = pnand %p230_p8, %p224_p5 }
  0x15   :  { %234 = shalt.err (!%p231_p9)
}
  0x16   :  { %s263_s0 = smov 128   ;;  %s264_s17 = smov 8  }
  0x17   :  { %31 = dma.hbm_to_vmem [thread:$0]  %s304_s1, 1280, %s26_s15, [#allocation3], %s263_s0, %s263_s0, %s264_s17  }
  0x18   :  { %255 = dma.done.wait [#allocation5], 16  }
  0x19   :  { %256 = vsyncadd [#allocation5], 4294967280 }
  0x1a   :  { %257 = dma.done.wait [#allocation3], 1280  }
  0x1b   :  { %258 = vsyncadd [#allocation3], 4294966016 }
  0x1c   :  { %38 = sfence }
  0x1d   :  { %v58_v0 = vlaneseq  ;;  %s61_s20 = sld [smem:[#allocation2]]  ;;  %v265_v1 = vmov 0   ;;  %v39_v6 = vld [vmem:[#allocation6] sm:$0xff]  ;;  %v41_v11 = vld [vmem:[#allocation6 + $0x8] sm:$0xff]  ;;  %v266_v20 = vmov 1   ;;  %v43_v22 = vld [vmem:[#allocation6 + $0x10] sm:$0xff] }
  0x1e   :  { %188 = vset.pattern.permute.xlu0 %v265_v1  ;;  %s176_s21 = sld [smem:[#allocation2 + $0x2]]  ;;  %190 = vset.pattern.permute.xlu1 %v265_v1  ;;  %v45_v23 = vld [vmem:[#allocation6 + $0x18] sm:$0xff]  ;;  %v47_v34 = vld [vmem:[#allocation6 + $0x20] sm:$0xff]  ;;  %v49_v35 = vld [vmem:[#allocation6 + $0x28] sm:$0xff]  ;;  %s267_s25 = smov [#allocation7]   ;;  %vm158_vm3 = vcmask 9216  }
  0x1f   :  { %v291_v2 = vshrl.u32 %v58_v0, 7  ;;  %s177_s22 = sld [smem:[#allocation2 + $0x4]]  ;;  %v53_v27 = vld [vmem:[#allocation6 + $0x38] sm:$0xff]  ;;  %v51_v39 = vld [vmem:[#allocation6 + $0x30] sm:$0xff]  ;;  %v57_v44 = vld [vmem:[#allocation6 + $0x48] sm:$0xff]  ;;  %s166_s26 = sshll.u32 %s267_s25, 4  ;;  %s167_s26 = int_to_ptr.vmem [resolvable:$true] %s166_s26 }
  0x20   :  { %s178_s23 = sld [smem:[#allocation2 + $0x1]]  ;;  %v55_v52 = vld [vmem:[#allocation6 + $0x40] sm:$0xff]  ;;  %s235_s27 = scalar_lea.vmem %s167_s26, 32 }
  0x21   :  { %vm60_vm0 = vcmp.eq.s32.totalorder %v291_v2, 0  ;;  %s179_s1 = sld [smem:[#allocation2 + $0x3]]  ;;  %vm64_vm1 = vcmp.eq.s32.totalorder %v291_v2, 1  ;;  %vm68_vm2 = vcmp.eq.s32.totalorder %v291_v2, 2  ;;  %v100_v30 = vsub.s32 0, %v291_v2  ;;  %p236_p10 = scmp.ne.s32.totalorder %s167_s26, %s235_s27 }
  0x22   :  { %s180_s24 = sld [smem:[#allocation2 + $0x5]]  ;;  %v105_v31 = vsub.s32 1, %v291_v2  ;;  %v111_v32 = vsub.s32 2, %v291_v2  ;;  %p240_p11 = scmp.lt.s32.totalorder %s167_s26, %s167_s26 }
  0x23   :  { %v62_v3 = vstv %s61_s20  ;;  %p241_p12 = scmp.lt.s32.totalorder %s235_s27, %s235_s27 }
  0x24   :  { %v63_v4 = vsel %vm60_vm0, %v62_v3, 0.0  ;;  %v66_v5 = vstv %s176_s21 }
  0x25   :  { %v67_v7 = vsel %vm64_vm1, %v66_v5, %v63_v4  ;;  %v70_v8 = vstv %s177_s22  ;;  %p242_p13 = por %p241_p12, %p240_p11 }
  0x26   :  { %v71_v9 = vsel %vm68_vm2, %v70_v8, %v67_v7  ;;  %v74_v10 = vstv %s178_s23 }
  0x27   :  { %v75_v12 = vsel %vm60_vm0, %v74_v10, 0.0  ;;  %v77_v13 = vstv %s179_s1  ;;  %v72_v14 = vmul.f32 %v71_v9, %v39_v6  ;;  %p243_p0 = pnand %p242_p13, %p236_p10 }
  0x28   :  { %v78_v15 = vsel %vm64_vm1, %v77_v13, %v75_v12  ;;  %v80_v16 = vstv %s180_s24 }
  0x29   :  { %v81_v17 = vsel %vm68_vm2, %v80_v16, %v78_v15 }
  0x2a   :  { %v82_v18 = vmul.f32 %v81_v17, %v41_v11 }
  0x2c   :  { %v83_v19 = vadd.f32 %v82_v18, %v72_v14 }
  0x2e   :  { %86 = vperm.xlu0 %188, %v83_v19  }
  0x32   :  { %189 = vset.pattern.permute.xlu0 %v266_v20 }
  0x33   :  { %91 = vperm.xlu0 %189, %v83_v19  }
  0xa9   :  { %v87_v21 = vpop.permute.xlu0 %86 }
  0xaa   :  { %v89_v25 = vmul.f32 %v87_v21, %v43_v22 }
  0xae   :  { %v92_v24 = vpop.permute.xlu0 %91 }
  0xaf   :  { %v94_v26 = vmul.f32 %v92_v24, %v45_v23 }
  0xb1   :  { %v95_v28 = vadd.f32 %v94_v26, %v89_v25 }
  0xb3   :  { %v96_v29 = vadd.f32 %v95_v28, %v53_v27 }
  0xb5   :  { %193 = vtanh.f32 %v96_v29 }
  0xc2   :  { %v194_v33 = vpop.eup %193 }
  0xc3   :  { %v101_v36 = vrot.slane %v194_v33, %v100_v30  ;;  %v106_v37 = vrot.slane %v194_v33, %v105_v31  ;;  %v112_v38 = vrot.slane %v194_v33, %v111_v32 }
  0xc5   :  { %v102_v40 = vmul.f32 %v101_v36, %v47_v34  ;;  %v107_v41 = vmul.f32 %v106_v37, %v49_v35  ;;  %v113_v43 = vmul.f32 %v112_v38, %v51_v39 }
  0xc7   :  { %v108_v42 = vadd.f32 %v107_v41, %v102_v40 }
  0xc9   :  { %v114_v45 = vadd.f32 %v113_v43, %v108_v42 }
  0xcb   :  { %v115_v46 = vadd.f32 %v114_v45, %v57_v44 }
  0xcd   :  { %195 = vtanh.f32 %v115_v46 }
  0xda   :  { %v196_v47 = vpop.eup %195 }
  0xdb   :  { %119 = vperm.xlu1 %190, %v196_v47  }
  0xdf   :  { %191 = vset.pattern.permute.xlu1 %v266_v20 }
  0xe0   :  { %124 = vperm.xlu1 %191, %v196_v47  }
  0xe4   :  { %192 = vset.pattern.permute.xlu1 %v265_v1 }
 0x156   :  { %v120_v48 = vpop.permute.xlu1 %119 }
 0x157   :  { %v122_v50 = vmul.f32 %v120_v48, %v43_v22 }
 0x15b   :  { %v125_v49 = vpop.permute.xlu1 %124 }
 0x15c   :  { %v127_v51 = vmul.f32 %v125_v49, %v45_v23 }
 0x15e   :  { %v128_v53 = vadd.f32 %v127_v51, %v122_v50 }
 0x160   :  { %v129_v54 = vadd.f32 %v128_v53, %v55_v52 }
 0x162   :  { %197 = vtanh.f32 %v129_v54 }
 0x16f   :  { %v198_v55 = vpop.eup %197 }
 0x170   :  { %v134_v56 = vrot.slane %v198_v55, %v100_v30  ;;  %v139_v57 = vrot.slane %v198_v55, %v105_v31 }
 0x172   :  { %v135_v58 = vmul.f32 %v134_v56, %v47_v34  ;;  %v140_v59 = vmul.f32 %v139_v57, %v49_v35 }
 0x174   :  { %v141_v60 = vadd.f32 %v140_v59, %v135_v58 }
 0x176   :  { %v142_v61 = vadd.f32 %v141_v60, %v57_v44 }
 0x178   :  { %199 = vtanh.f32 %v142_v61 }
 0x185   :  { %v200_v62 = vpop.eup %199 }
 0x186   :  { %151 = vperm.xlu0 %189, %v200_v62   ;;  %146 = vperm.xlu1 %192, %v200_v62  }
 0x201   :  { %v152_v63 = vpop.permute.xlu0 %151  ;;  %v147_v0 = vpop.permute.xlu1 %146 }
 0x202   :  { %v154_v1 = vmul.f32 %v152_v63, %v45_v23  ;;  %v149_v2 = vmul.f32 %v147_v0, %v43_v22 }
 0x204   :  { %v155_v3 = vadd.f32 %v154_v1, %v149_v2 }
 0x206   :  { %v156_v4 = vadd.f32 %v155_v3, %v55_v52 }
 0x208   :  { %201 = vtanh.f32 %v156_v4 }
 0x215   :  { %v202_v5 = vpop.eup %201 }
 0x216   :  { %159 = vst.msk [vmem:[#allocation7] sm:$0x3] %vm158_vm3, %v202_v5 }
 0x217   :  { %246 = shalt.err (!%p243_p0)
}
 0x218   :  { %169 = dma.vmem_to_hbm [thread:$0]  %s167_s26, 32, %s305_s2, [#allocation4]  }
 0x219   :  { %259 = dma.done.wait [#allocation4], 32  }
 0x21a   :  { %260 = vsyncadd [#allocation4], 4294967264 }
 0x21b   :  { %173 = vsyncpa [#allocation3], 1 }
 0x21c   :  { %174 = vsyncpa [#allocation4], 1 }
 0x21d   :  { %175 = vsyncpa [#allocation5], 1 }

</bundles_post_ra>
